<compile_context>
chip_gen: v7x
topology: tpu7x:2x2x1
jax: 0.10.0
libtpu: 0.0.40
codegen_flags: <defaults>
</compile_context>

<pallas_src>
import functools

import jax
import jax.numpy as jnp
from jax import lax
from jax.experimental import pallas as pl
from jax.experimental.pallas import tpu as pltpu

EPS = 1e-5
LANE = 128
SUBLANE = 8


def _rup(n, m):
    return ((n + m - 1) // m) * m


# ----------------------------- Pallas kernels ------------------------------ #

def _make_pass_a_kernel(TB, L_out, OFF, K_in, Cp):
    """conv1 (k=3,pad=1,stride=s) + shortcut conv (k=1,stride=s) as two matmuls over
    one im2col operand, plus centered partial BN stats for both branches."""
    rows = TB * L_out
    inv_rows = 1.0 / rows

    def kernel(a_ref, w1_ref, ws_ref, y1_ref, ys_ref, st1_ref, sts_ref):
        a = a_ref[...].reshape(rows, K_in)
        acc1 = jnp.dot(a, w1_ref[...], preferred_element_type=jnp.float32)
        accs = jnp.dot(a, ws_ref[...], preferred_element_type=jnp.float32)

        # Single sublane-aligned bulk store of the conv1 interior (rows [OFF, OFF+L_out)).
        # Pad rows are never stored: pass B masks them to zero before conv2.
        y1_ref[:, OFF:OFF + L_out, :] = acc1.reshape(TB, L_out, Cp).astype(y1_ref.dtype)
        ys_ref[...] = accs.reshape(TB, L_out, Cp).astype(ys_ref.dtype)

        def stats(acc, st_ref):
            s = jnp.sum(acc, axis=0)                       # (Cp,)
            d = acc - (s * inv_rows)[None, :]              # centered -> stable variance
            st_ref[:, 0:1, :] = s.reshape(1, 1, Cp)
            st_ref[:, 1:2, :] = jnp.sum(d * d, axis=0).reshape(1, 1, Cp)

        stats(acc1, st1_ref)
        stats(accs, sts_ref)

    return kernel


def _make_pass_b_kernel(TB, L_out, L1, OFF, Cp, mxu_dtype):
    """Folded BN1 (scale/shift) + ReLU, then conv2 (k=3,pad=1,s=1) as 3 shifted MXU
    matmuls, plus centered partial BN2 stats."""
    rows = TB * L_out
    inv_rows = 1.0 / rows

    def kernel(y1_ref, w2_ref, sc1_ref, sh1_ref, y2_ref, st2_ref):
        y1 = y1_ref[...].astype(jnp.float32)                       # (TB, L1, Cp)
        row = lax.broadcasted_iota(jnp.int32, (1, L1, 1), 1)
        interior = (row >= OFF) & (row < OFF + L_out)
        # BN1 folded to one FMA + ReLU; pad rows forced to zero (conv2's padding).
        h1 = jnp.where(interior,
                       jnp.maximum(y1 * sc1_ref[...] + sh1_ref[...], 0.0),
                       0.0).astype(mxu_dtype)

        acc2 = jnp.zeros((rows, Cp), jnp.float32)
        # TODO(synk): on v6e/v7x the 3 taps could be folded into one K=3*Cp bf16 dot.
        for k in range(3):
            hk = h1[:, OFF - 1 + k:OFF - 1 + k + L_out, :].reshape(rows, Cp)
            acc2 = acc2 + jnp.dot(hk, w2_ref[k], preferred_element_type=jnp.float32)

        y2_ref[...] = acc2.reshape(TB, L_out, Cp).astype(y2_ref.dtype)
        s = jnp.sum(acc2, axis=0)
        d = acc2 - (s * inv_rows)[None, :]
        st2_ref[:, 0:1, :] = s.reshape(1, 1, Cp)
        st2_ref[:, 1:2, :] = jnp.sum(d * d, axis=0).reshape(1, 1, Cp)

    return kernel


def _finalize_kernel(y2_ref, ys_ref, sc2_ref, scs_ref, shc_ref, o_ref):
    # Folded BN2 + BN_shortcut affines, residual add, ReLU — pure VPU FMA epilogue.
    o_ref[...] = jnp.maximum(
        y2_ref[...].astype(jnp.float32) * sc2_ref[...]
        + ys_ref[...].astype(jnp.float32) * scs_ref[...]
        + shc_ref[...], 0.0).astype(o_ref.dtype)


# ------------------------------- wrapper ----------------------------------- #

def _bn_fold(stats, gamma_p, beta_p, rows_per_block, total_rows):
    """Chan-style cross-block merge of centered partial stats -> BN scale/shift."""
    s = stats[:, 0, :]                                   # (G, Cp) per-block sums
    q = stats[:, 1, :]                                   # (G, Cp) per-block sum (x - mu_b)^2
    mu_b = s / rows_per_block
    mu = jnp.sum(s, axis=0) / total_rows
    q_tot = jnp.sum(q, axis=0) + rows_per_block * jnp.sum((mu_b - mu[None, :]) ** 2, axis=0)
    var = jnp.maximum(q_tot / total_rows, 0.0)           # biased variance (training-mode BN)
    scale = gamma_p * lax.rsqrt(var + EPS)
    shift = beta_p - mu * scale
    return scale.reshape(1, -1), shift.reshape(1, -1)


def _auto_seq_per_block(B, L_out, Cp, vmem_limit_bytes):
    """Largest batch tile that (a) keeps >= 2 grid steps when B >= 2 (megacore +
    pipeline overlap) and (b) keeps the per-block working set within the budget."""
    row_budget = max(1, (vmem_limit_bytes // 2) // (12 * Cp * 4))   # ~12 f32 slabs live
    best = 1
    for tb in range(1, B + 1):
        if B % tb:
            continue
        g = B // tb
        if B >= 2 and g < 2:
            continue
        if tb * L_out > row_budget:
            continue
        best = tb
    return best


def resblk_pallas(x, p, stride, *, seq_per_block=None, use_bf16=False,
                  vmem_limit_bytes=32 * 1024 * 1024):
    """x: (B, C_in, L) float32, NCL like PyTorch.  Returns (B, C_out, L_out) float32.

    use_bf16: store HBM intermediates / feed MXU operands in bfloat16 (stats and
    accumulators stay f32).  Recommended for the mem-bound passes on v5e/v6e/v7x.
    vmem_limit_bytes: 32 MiB default is safe everywhere; raise to ~48 MiB on v7x,
    64-100 MiB on v5e/v6e together with a larger seq_per_block.
    """
    B, C_in, L = x.shape
    C_out = p["w1"].shape[0]
    L_out = (L + 2 - 3) // stride + 1
    Cp = _rup(max(C_out, LANE), LANE)              # lane-dense channel axis
    K_in = 3 * C_in
    OFF = SUBLANE                                  # aligned interior offset in y1pad
    L1 = L_out + OFF + 1
    TB = (_auto_seq_per_block(B, L_out, Cp, vmem_limit_bytes)
          if seq_per_block is None else seq_per_block)
    assert B % TB == 0, "seq_per_block must divide the batch"
    G = B // TB
    rows_blk = TB * L_out
    M = B * L_out
    f32 = jnp.float32
    wd = jnp.bfloat16 if use_bf16 else jnp.float32    # intermediate / MXU-operand dtype

    # ---- one-time layout prep (cheap glue; im2col is only 3*C_in lanes wide) ----
    xt = jnp.transpose(x, (0, 2, 1)).astype(f32)                    # (B, L, C_in)
    x_pad = jnp.pad(xt, ((0, 0), (1, 1), (0, 0)))                   # (B, L+2, C_in)
    span = stride * (L_out - 1) + 1
    x_i2c = jnp.concatenate(
        [x_pad[:, k:k + span:stride, :] for k in range(3)], axis=-1).astype(wd)

    # conv1 weight as a single (3*C_in, Cp) matrix; shortcut weight embedded in the
    # same K (rows [C_in, 2*C_in) = its k=1 tap) so pass A reuses one operand.
    w1p = jnp.zeros((K_in, Cp), f32).at[:, :C_out].set(
        jnp.transpose(p["w1"], (2, 1, 0)).reshape(K_in, C_out).astype(f32)).astype(wd)
    wsp = jnp.zeros((K_in, Cp), f32).at[C_in:2 * C_in, :C_out].set(
        p["ws"][:, :, 0].T.astype(f32)).astype(wd)
    w2p = jnp.zeros((3, Cp, Cp), f32).at[:, :C_out, :C_out].set(
        jnp.transpose(p["w2"], (2, 1, 0)).astype(f32)).astype(wd)

    def cpad(v, fill):
        return jnp.full((Cp,), fill, f32).at[:C_out].set(v.astype(f32))

    g1p, be1p = cpad(p["g1"], 1.0), cpad(p["be1"], 0.0)
    g2p, be2p = cpad(p["g2"], 1.0), cpad(p["be2"], 0.0)
    gsp, besp = cpad(p["gs"], 1.0), cpad(p["bes"], 0.0)
    # conv biases b1/b2/bs dropped: constants cancel in training-mode BN.

    cparams = pltpu.CompilerParams(
        dimension_semantics=("parallel",),         # grid = independent batch tiles
        vmem_limit_bytes=vmem_limit_bytes,
    )

    # ------- pass A: conv1 + shortcut conv + centered partial BN stats ------- #
    y1pad, ysc, st1, sts = pl.pallas_call(
        _make_pass_a_kernel(TB, L_out, OFF, K_in, Cp),
        grid=(G,),
        in_specs=[
            pl.BlockSpec((TB, L_out, K_in), lambda b: (b, 0, 0)),
            pl.BlockSpec((K_in, Cp), lambda b: (0, 0)),
            pl.BlockSpec((K_in, Cp), lambda b: (0, 0)),
        ],
        out_specs=[
            pl.BlockSpec((TB, L1, Cp), lambda b: (b, 0, 0)),
            pl.BlockSpec((TB, L_out, Cp), lambda b: (b, 0, 0)),
            pl.BlockSpec((1, 2, Cp), lambda b: (b, 0, 0)),
            pl.BlockSpec((1, 2, Cp), lambda b: (b, 0, 0)),
        ],
        out_shape=[
            jax.ShapeDtypeStruct((B, L1, Cp), wd),
            jax.ShapeDtypeStruct((B, L_out, Cp), wd),
            jax.ShapeDtypeStruct((G, 2, Cp), f32),
            jax.ShapeDtypeStruct((G, 2, Cp), f32),
        ],
        compiler_params=cparams,
    )(x_i2c, w1p, wsp)

    scale1, shift1 = _bn_fold(st1, g1p, be1p, rows_blk, M)

    # ------- pass B: BN1+ReLU (folded), conv2, centered partial BN2 stats ------- #
    y2, st2 = pl.pallas_call(
        _make_pass_b_kernel(TB, L_out, L1, OFF, Cp, wd),
        grid=(G,),
        in_specs=[
            pl.BlockSpec((TB, L1, Cp), lambda b: (b, 0, 0)),
            pl.BlockSpec((3, Cp, Cp), lambda b: (0, 0, 0)),
            pl.BlockSpec((1, Cp), lambda b: (0, 0)),
            pl.BlockSpec((1, Cp), lambda b: (0, 0)),
        ],
        out_specs=[
            pl.BlockSpec((TB, L_out, Cp), lambda b: (b, 0, 0)),
            pl.BlockSpec((1, 2, Cp), lambda b: (b, 0, 0)),
        ],
        out_shape=[
            jax.ShapeDtypeStruct((B, L_out, Cp), wd),
            jax.ShapeDtypeStruct((G, 2, Cp), f32),
        ],
        compiler_params=cparams,
    )(y1pad, w2p, scale1, shift1)

    scale2, shift2 = _bn_fold(st2, g2p, be2p, rows_blk, M)
    scales, shifts = _bn_fold(sts, gsp, besp, rows_blk, M)
    shiftc = shift2 + shifts                      # combined shift of both branches

    # ------- pass C: folded BN2/BNs affine + residual add + ReLU (aliased) ------- #
    out = pl.pallas_call(
        _finalize_kernel,
        grid=(G,),
        in_specs=[
            pl.BlockSpec((TB, L_out, Cp), lambda b: (b, 0, 0)),
            pl.BlockSpec((TB, L_out, Cp), lambda b: (b, 0, 0)),
            pl.BlockSpec((1, Cp), lambda b: (0, 0)),
            pl.BlockSpec((1, Cp), lambda b: (0, 0)),
            pl.BlockSpec((1, Cp), lambda b: (0, 0)),
        ],
        out_specs=pl.BlockSpec((TB, L_out, Cp), lambda b: (b, 0, 0)),
        out_shape=jax.ShapeDtypeStruct((B, L_out, Cp), wd),
        input_output_aliases={0: 0},              # reuse the y2 slab for the output
        compiler_params=cparams,
    )(y2, ysc, scale2, scales, shiftc)

    return jnp.transpose(out[:, :, :C_out], (0, 2, 1)).astype(f32)   # back to NCL


# --------------------------- plain-JAX reference ---------------------------- #

def resblk_ref(x, p, stride):
    def conv1d(x, w, b, s, pad):
        y = jax.lax.conv_general_dilated(
            x, w, window_strides=(s,), padding=[(pad, pad)],
            dimension_numbers=("NCH", "OIH", "NCH"))
        return y + b[None, :, None]

    def bn(y, g, be):
        m = y.mean(axis=(0, 2), keepdims=True)
        v = ((y - m) ** 2).mean(axis=(0, 2), keepdims=True)
        return (y - m) / jnp.sqrt(v + EPS) * g[None, :, None] + be[None, :, None]

    h = jax.nn.relu(bn(conv1d(x, p["w1"], p["b1"], stride, 1), p["g1"], p["be1"]))
    h = bn(conv1d(h, p["w2"], p["b2"], 1, 1), p["g2"], p["be2"])
    sc = bn(conv1d(x, p["ws"], p["bs"], stride, 0), p["gs"], p["bes"])
    return jax.nn.relu(h + sc)


# ---------------------------------- main ------------------------------------ #

if __name__ == "__main__":
    B, C_in, C_out, L, stride = 2, 4, 8, 16, 2   # ch_out != ch_in so the module has .extra

    key = jax.random.PRNGKey(0)
    ks = jax.random.split(key, 13)
    f32 = jnp.float32
    params = dict(
        w1=(0.3 * jax.random.normal(ks[0], (C_out, C_in, 3))).astype(f32),
        b1=(0.1 * jax.random.normal(ks[1], (C_out,))).astype(f32),
        g1=(1.0 + 0.1 * jax.random.normal(ks[2], (C_out,))).astype(f32),
        be1=(0.1 * jax.random.normal(ks[3], (C_out,))).astype(f32),
        w2=(0.3 * jax.random.normal(ks[4], (C_out, C_out, 3))).astype(f32),
        b2=(0.1 * jax.random.normal(ks[5], (C_out,))).astype(f32),
        g2=(1.0 + 0.1 * jax.random.normal(ks[6], (C_out,))).astype(f32),
        be2=(0.1 * jax.random.normal(ks[7], (C_out,))).astype(f32),
        ws=(0.3 * jax.random.normal(ks[8], (C_out, C_in, 1))).astype(f32),
        bs=(0.1 * jax.random.normal(ks[9], (C_out,))).astype(f32),
        gs=(1.0 + 0.1 * jax.random.normal(ks[10], (C_out,))).astype(f32),
        bes=(0.1 * jax.random.normal(ks[11], (C_out,))).astype(f32),
    )
    x = jax.random.normal(ks[12], (B, C_in, L)).astype(f32)

    ref = jax.block_until_ready(resblk_ref(x, params, stride))
    L_out = (L + 2 - 3) // stride + 1

    # f32 path: strict check against the reference.
    fwd = jax.jit(functools.partial(resblk_pallas, stride=stride))
    out = jax.block_until_ready(fwd(x, params))
    assert out.shape == (B, C_out, L_out), out.shape
    max_err = float(jnp.max(jnp.abs(out - ref)))
    assert max_err < 1e-3, f"f32 path mismatch vs reference: {max_err}"

    # bf16 intermediates / MXU operands (the bandwidth-saving option): loose bound,
    # BN re-normalization keeps the reduced-precision error small.
    fwd_bf16 = jax.jit(functools.partial(resblk_pallas, stride=stride, use_bf16=True))
    out_bf16 = jax.block_until_ready(fwd_bf16(x, params))
    max_err_bf16 = float(jnp.max(jnp.abs(out_bf16 - ref)))
    assert max_err_bf16 < 1.5e-1, f"bf16 path mismatch vs reference: {max_err_bf16}"

    print("KERNEL_OK")
</pallas_src>

<mosaic_0001>
module attributes {stable_mosaic.version = 11 : i64} {
  func.func @kernel(%arg0: i32, %arg1: memref<1x8x12xf32, #tpu.memory_space<vmem>>, %arg2: memref<12x128xf32, #tpu.memory_space<vmem>>, %arg3: memref<12x128xf32, #tpu.memory_space<vmem>>, %arg4: memref<1x17x128xf32, #tpu.memory_space<vmem>>, %arg5: memref<1x8x128xf32, #tpu.memory_space<vmem>>, %arg6: memref<1x2x128xf32, #tpu.memory_space<vmem>>, %arg7: memref<1x2x128xf32, #tpu.memory_space<vmem>>) attributes {dimension_semantics = [#tpu.dimension_semantics<parallel>], iteration_bounds = array<i64: 2>, scalar_prefetch = 0 : i64, scratch_operands = 0 : i64, tpu.core_type = #tpu.core_type<tc>, window_params = [{transform_indices = @transform_0, window_bounds = array<i64: 1, 8, 12>}, {pipeline_mode = #tpu.pipeline_mode<synchronous>, transform_indices = @transform_1, window_bounds = array<i64: 12, 128>}, {pipeline_mode = #tpu.pipeline_mode<synchronous>, transform_indices = @transform_2, window_bounds = array<i64: 12, 128>}, {transform_indices = @transform_3, window_bounds = array<i64: 1, 17, 128>}, {transform_indices = @transform_4, window_bounds = array<i64: 1, 8, 128>}, {transform_indices = @transform_5, window_bounds = array<i64: 1, 2, 128>}, {transform_indices = @transform_6, window_bounds = array<i64: 1, 2, 128>}]} {
    %c0 = arith.constant 0 : index
    %c0_0 = arith.constant 0 : index
    %c0_1 = arith.constant 0 : index
    %0 = vector.load %arg1[%c0, %c0_0, %c0_1] : memref<1x8x12xf32, #tpu.memory_space<vmem>>, vector<1x8x12xf32>
    %1 = vector.shape_cast %0 : vector<1x8x12xf32> to vector<8x12xf32>
    %c0_2 = arith.constant 0 : index
    %c0_3 = arith.constant 0 : index
    %2 = vector.load %arg2[%c0_2, %c0_3] : memref<12x128xf32, #tpu.memory_space<vmem>>, vector<12x128xf32>
    %cst = arith.constant dense<0.000000e+00> : vector<8x128xf32>
    %3 = tpu.matmul %1, %2, %cst {dimension_numbers = #tpu.dot_dimension_numbers<[1], [0], [0], [1], [0, 0, 1, 1], [], []>} : vector<8x12xf32>, vector<12x128xf32>, vector<8x128xf32> -> vector<8x128xf32>
    %c0_4 = arith.constant 0 : index
    %c0_5 = arith.constant 0 : index
    %4 = vector.load %arg3[%c0_4, %c0_5] : memref<12x128xf32, #tpu.memory_space<vmem>>, vector<12x128xf32>
    %cst_6 = arith.constant dense<0.000000e+00> : vector<8x128xf32>
    %5 = tpu.matmul %1, %4, %cst_6 {dimension_numbers = #tpu.dot_dimension_numbers<[1], [0], [0], [1], [0, 0, 1, 1], [], []>} : vector<8x12xf32>, vector<12x128xf32>, vector<8x128xf32> -> vector<8x128xf32>
    %6 = vector.shape_cast %3 : vector<8x128xf32> to vector<1x8x128xf32>
    %c0_7 = arith.constant 0 : index
    %c8 = arith.constant 8 : index
    %c0_8 = arith.constant 0 : index
    %7 = vector.load %arg4[%c0_7, %c8, %c0_8] : memref<1x17x128xf32, #tpu.memory_space<vmem>>, vector<1x8x128xf32>
    tpu.vector_store %arg4[%c0_7, %c8, %c0_8], %6 {strides = array<i32>} : memref<1x17x128xf32, #tpu.memory_space<vmem>>, vector<1x8x128xf32>,
    %8 = vector.shape_cast %5 : vector<8x128xf32> to vector<1x8x128xf32>
    %c0_9 = arith.constant 0 : index
    %c0_10 = arith.constant 0 : index
    %c0_11 = arith.constant 0 : index
    %9 = vector.load %arg5[%c0_9, %c0_10, %c0_11] : memref<1x8x128xf32, #tpu.memory_space<vmem>>, vector<1x8x128xf32>
    tpu.vector_store %arg5[%c0_9, %c0_10, %c0_11], %8 {strides = array<i32>} : memref<1x8x128xf32, #tpu.memory_space<vmem>>, vector<1x8x128xf32>,
    %cst_12 = arith.constant dense<0.000000e+00> : vector<128xf32>
    %10 = vector.multi_reduction <add>, %3, %cst_12 [0] : vector<8x128xf32> to vector<128xf32>
    %cst_13 = arith.constant 1.250000e-01 : f32
    %11 = vector.broadcast %cst_13 : f32 to vector<128xf32>
    %12 = arith.mulf %10, %11 : vector<128xf32>
    %13 = vector.shape_cast %12 : vector<128xf32> to vector<1x128xf32>
    %14 = vector.broadcast %13 : vector<1x128xf32> to vector<8x128xf32>
    %15 = arith.subf %3, %14 : vector<8x128xf32>
    %16 = vector.shape_cast %10 : vector<128xf32> to vector<1x1x128xf32>
    %c0_14 = arith.constant 0 : index
    %c0_15 = arith.constant 0 : index
    %c0_16 = arith.constant 0 : index
    %17 = vector.load %arg6[%c0_14, %c0_15, %c0_16] : memref<1x2x128xf32, #tpu.memory_space<vmem>>, vector<1x1x128xf32>
    tpu.vector_store %arg6[%c0_14, %c0_15, %c0_16], %16 {strides = array<i32>} : memref<1x2x128xf32, #tpu.memory_space<vmem>>, vector<1x1x128xf32>,
    %18 = arith.mulf %15, %15 : vector<8x128xf32>
    %cst_17 = arith.constant dense<0.000000e+00> : vector<128xf32>
    %19 = vector.multi_reduction <add>, %18, %cst_17 [0] : vector<8x128xf32> to vector<128xf32>
    %20 = vector.shape_cast %19 : vector<128xf32> to vector<1x1x128xf32>
    %c0_18 = arith.constant 0 : index
    %c1 = arith.constant 1 : index
    %c0_19 = arith.constant 0 : index
    %21 = vector.load %arg6[%c0_18, %c1, %c0_19] : memref<1x2x128xf32, #tpu.memory_space<vmem>>, vector<1x1x128xf32>
    tpu.vector_store %arg6[%c0_18, %c1, %c0_19], %20 {strides = array<i32>} : memref<1x2x128xf32, #tpu.memory_space<vmem>>, vector<1x1x128xf32>,
    %cst_20 = arith.constant dense<0.000000e+00> : vector<128xf32>
    %22 = vector.multi_reduction <add>, %5, %cst_20 [0] : vector<8x128xf32> to vector<128xf32>
    %cst_21 = arith.constant 1.250000e-01 : f32
    %23 = vector.broadcast %cst_21 : f32 to vector<128xf32>
    %24 = arith.mulf %22, %23 : vector<128xf32>
    %25 = vector.shape_cast %24 : vector<128xf32> to vector<1x128xf32>
    %26 = vector.broadcast %25 : vector<1x128xf32> to vector<8x128xf32>
    %27 = arith.subf %5, %26 : vector<8x128xf32>
    %28 = vector.shape_cast %22 : vector<128xf32> to vector<1x1x128xf32>
    %c0_22 = arith.constant 0 : index
    %c0_23 = arith.constant 0 : index
    %c0_24 = arith.constant 0 : index
    %29 = vector.load %arg7[%c0_22, %c0_23, %c0_24] : memref<1x2x128xf32, #tpu.memory_space<vmem>>, vector<1x1x128xf32>
    tpu.vector_store %arg7[%c0_22, %c0_23, %c0_24], %28 {strides = array<i32>} : memref<1x2x128xf32, #tpu.memory_space<vmem>>, vector<1x1x128xf32>,
    %30 = arith.mulf %27, %27 : vector<8x128xf32>
    %cst_25 = arith.constant dense<0.000000e+00> : vector<128xf32>
    %31 = vector.multi_reduction <add>, %30, %cst_25 [0] : vector<8x128xf32> to vector<128xf32>
    %32 = vector.shape_cast %31 : vector<128xf32> to vector<1x1x128xf32>
    %c0_26 = arith.constant 0 : index
    %c1_27 = arith.constant 1 : index
    %c0_28 = arith.constant 0 : index
    %33 = vector.load %arg7[%c0_26, %c1_27, %c0_28] : memref<1x2x128xf32, #tpu.memory_space<vmem>>, vector<1x1x128xf32>
    tpu.vector_store %arg7[%c0_26, %c1_27, %c0_28], %32 {strides = array<i32>} : memref<1x2x128xf32, #tpu.memory_space<vmem>>, vector<1x1x128xf32>,
    return
  }
  func.func @transform_0(%arg0: i32) -> (i32, i32, i32) {
    %c0_i32 = arith.constant 0 : i32
    %c0_i32_0 = arith.constant 0 : i32
    %c0_i32_1 = arith.constant 0 : i32
    return %arg0, %c0_i32, %c0_i32_0 : i32, i32, i32
  }
  func.func @transform_1(%arg0: i32) -> (i32, i32) {
    %c0_i32 = arith.constant 0 : i32
    %c0_i32_0 = arith.constant 0 : i32
    %c0_i32_1 = arith.constant 0 : i32
    return %c0_i32, %c0_i32_0 : i32, i32
  }
  func.func @transform_2(%arg0: i32) -> (i32, i32) {
    %c0_i32 = arith.constant 0 : i32
    %c0_i32_0 = arith.constant 0 : i32
    %c0_i32_1 = arith.constant 0 : i32
    return %c0_i32, %c0_i32_0 : i32, i32
  }
  func.func @transform_3(%arg0: i32) -> (i32, i32, i32) {
    %c0_i32 = arith.constant 0 : i32
    %c0_i32_0 = arith.constant 0 : i32
    %c0_i32_1 = arith.constant 0 : i32
    return %arg0, %c0_i32, %c0_i32_0 : i32, i32, i32
  }
  func.func @transform_4(%arg0: i32) -> (i32, i32, i32) {
    %c0_i32 = arith.constant 0 : i32
    %c0_i32_0 = arith.constant 0 : i32
    %c0_i32_1 = arith.constant 0 : i32
    return %arg0, %c0_i32, %c0_i32_0 : i32, i32, i32
  }
  func.func @transform_5(%arg0: i32) -> (i32, i32, i32) {
    %c0_i32 = arith.constant 0 : i32
    %c0_i32_0 = arith.constant 0 : i32
    %c0_i32_1 = arith.constant 0 : i32
    return %arg0, %c0_i32, %c0_i32_0 : i32, i32, i32
  }
  func.func @transform_6(%arg0: i32) -> (i32, i32, i32) {
    %c0_i32 = arith.constant 0 : i32
    %c0_i32_0 = arith.constant 0 : i32
    %c0_i32_1 = arith.constant 0 : i32
    return %arg0, %c0_i32, %c0_i32_0 : i32, i32, i32
  }
}

module attributes {stable_mosaic.version = 11 : i64} {
  func.func @kernel(%arg0: i32, %arg1: memref<1x17x128xf32, #tpu.memory_space<vmem>>, %arg2: memref<3x128x128xf32, #tpu.memory_space<vmem>>, %arg3: memref<1x128xf32, #tpu.memory_space<vmem>>, %arg4: memref<1x128xf32, #tpu.memory_space<vmem>>, %arg5: memref<1x8x128xf32, #tpu.memory_space<vmem>>, %arg6: memref<1x2x128xf32, #tpu.memory_space<vmem>>) attributes {dimension_semantics = [#tpu.dimension_semantics<parallel>], iteration_bounds = array<i64: 2>, scalar_prefetch = 0 : i64, scratch_operands = 0 : i64, tpu.core_type = #tpu.core_type<tc>, window_params = [{transform_indices = @transform_0, window_bounds = array<i64: 1, 17, 128>}, {pipeline_mode = #tpu.pipeline_mode<synchronous>, transform_indices = @transform_1, window_bounds = array<i64: 3, 128, 128>}, {pipeline_mode = #tpu.pipeline_mode<synchronous>, transform_indices = @transform_2, window_bounds = array<i64: 1, 128>}, {pipeline_mode = #tpu.pipeline_mode<synchronous>, transform_indices = @transform_3, window_bounds = array<i64: 1, 128>}, {transform_indices = @transform_4, window_bounds = array<i64: 1, 8, 128>}, {transform_indices = @transform_5, window_bounds = array<i64: 1, 2, 128>}]} {
    %c0 = arith.constant 0 : index
    %c0_0 = arith.constant 0 : index
    %c0_1 = arith.constant 0 : index
    %0 = vector.load %arg1[%c0, %c0_0, %c0_1] : memref<1x17x128xf32, #tpu.memory_space<vmem>>, vector<1x17x128xf32>
    %1 = tpu.iota {dimensions = array<i32: 1>} : vector<1x17x1xi32>
    %c8_i32 = arith.constant 8 : i32
    %2 = vector.broadcast %c8_i32 : i32 to vector<1x17x1xi32>
    %3 = arith.cmpi sge, %1, %2 : vector<1x17x1xi32>
    %c16_i32 = arith.constant 16 : i32
    %4 = vector.broadcast %c16_i32 : i32 to vector<1x17x1xi32>
    %5 = arith.cmpi slt, %1, %4 : vector<1x17x1xi32>
    %6 = arith.andi %3, %5 : vector<1x17x1xi1>
    %c0_2 = arith.constant 0 : index
    %c0_3 = arith.constant 0 : index
    %7 = vector.load %arg3[%c0_2, %c0_3] : memref<1x128xf32, #tpu.memory_space<vmem>>, vector<1x128xf32>
    %8 = vector.shape_cast %7 : vector<1x128xf32> to vector<1x1x128xf32>
    %9 = vector.broadcast %8 : vector<1x1x128xf32> to vector<1x17x128xf32>
    %10 = arith.mulf %0, %9 : vector<1x17x128xf32>
    %c0_4 = arith.constant 0 : index
    %c0_5 = arith.constant 0 : index
    %11 = vector.load %arg4[%c0_4, %c0_5] : memref<1x128xf32, #tpu.memory_space<vmem>>, vector<1x128xf32>
    %12 = vector.shape_cast %11 : vector<1x128xf32> to vector<1x1x128xf32>
    %13 = vector.broadcast %12 : vector<1x1x128xf32> to vector<1x17x128xf32>
    %14 = arith.addf %10, %13 : vector<1x17x128xf32>
    %cst = arith.constant 0.000000e+00 : f32
    %15 = vector.broadcast %cst : f32 to vector<1x17x128xf32>
    %16 = arith.maximumf %14, %15 : vector<1x17x128xf32>
    %cst_6 = arith.constant 0.000000e+00 : f32
    %17 = vector.shape_cast %6 : vector<1x17x1xi1> to vector<1x17x1xi1>
    %18 = vector.broadcast %17 : vector<1x17x1xi1> to vector<1x17x128xi1>
    %19 = vector.broadcast %cst_6 : f32 to vector<1x17x128xf32>
    %20 = arith.select %18, %16, %19 : vector<1x17x128xi1>, vector<1x17x128xf32>
    %cst_7 = arith.constant 0.000000e+00 : f32
    %21 = vector.broadcast %cst_7 : f32 to vector<8x128xf32>
    %22 = vector.extract_strided_slice %20 {offsets = [0, 7, 0], sizes = [1, 8, 128], strides = [1, 1, 1]} : vector<1x17x128xf32> to vector<1x8x128xf32>
    %23 = vector.shape_cast %22 : vector<1x8x128xf32> to vector<8x128xf32>
    %c0_8 = arith.constant 0 : index
    %c0_9 = arith.constant 0 : index
    %c0_10 = arith.constant 0 : index
    %24 = vector.load %arg2[%c0_8, %c0_9, %c0_10] : memref<3x128x128xf32, #tpu.memory_space<vmem>>, vector<1x128x128xf32>
    %25 = vector.shape_cast %24 : vector<1x128x128xf32> to vector<128x128xf32>
    %cst_11 = arith.constant dense<0.000000e+00> : vector<8x128xf32>
    %26 = tpu.matmul %23, %25, %cst_11 {dimension_numbers = #tpu.dot_dimension_numbers<[1], [0], [0], [1], [0, 0, 1, 1], [], []>} : vector<8x128xf32>, vector<128x128xf32>, vector<8x128xf32> -> vector<8x128xf32>
    %27 = arith.addf %21, %26 : vector<8x128xf32>
    %28 = vector.extract_strided_slice %20 {offsets = [0, 8, 0], sizes = [1, 8, 128], strides = [1, 1, 1]} : vector<1x17x128xf32> to vector<1x8x128xf32>
    %29 = vector.shape_cast %28 : vector<1x8x128xf32> to vector<8x128xf32>
    %c1 = arith.constant 1 : index
    %c0_12 = arith.constant 0 : index
    %c0_13 = arith.constant 0 : index
    %30 = vector.load %arg2[%c1, %c0_12, %c0_13] : memref<3x128x128xf32, #tpu.memory_space<vmem>>, vector<1x128x128xf32>
    %31 = vector.shape_cast %30 : vector<1x128x128xf32> to vector<128x128xf32>
    %cst_14 = arith.constant dense<0.000000e+00> : vector<8x128xf32>
    %32 = tpu.matmul %29, %31, %cst_14 {dimension_numbers = #tpu.dot_dimension_numbers<[1], [0], [0], [1], [0, 0, 1, 1], [], []>} : vector<8x128xf32>, vector<128x128xf32>, vector<8x128xf32> -> vector<8x128xf32>
    %33 = arith.addf %27, %32 : vector<8x128xf32>
    %34 = vector.extract_strided_slice %20 {offsets = [0, 9, 0], sizes = [1, 8, 128], strides = [1, 1, 1]} : vector<1x17x128xf32> to vector<1x8x128xf32>
    %35 = vector.shape_cast %34 : vector<1x8x128xf32> to vector<8x128xf32>
    %c2 = arith.constant 2 : index
    %c0_15 = arith.constant 0 : index
    %c0_16 = arith.constant 0 : index
    %36 = vector.load %arg2[%c2, %c0_15, %c0_16] : memref<3x128x128xf32, #tpu.memory_space<vmem>>, vector<1x128x128xf32>
    %37 = vector.shape_cast %36 : vector<1x128x128xf32> to vector<128x128xf32>
    %cst_17 = arith.constant dense<0.000000e+00> : vector<8x128xf32>
    %38 = tpu.matmul %35, %37, %cst_17 {dimension_numbers = #tpu.dot_dimension_numbers<[1], [0], [0], [1], [0, 0, 1, 1], [], []>} : vector<8x128xf32>, vector<128x128xf32>, vector<8x128xf32> -> vector<8x128xf32>
    %39 = arith.addf %33, %38 : vector<8x128xf32>
    %40 = vector.shape_cast %39 : vector<8x128xf32> to vector<1x8x128xf32>
    %c0_18 = arith.constant 0 : index
    %c0_19 = arith.constant 0 : index
    %c0_20 = arith.constant 0 : index
    %41 = vector.load %arg5[%c0_18, %c0_19, %c0_20] : memref<1x8x128xf32, #tpu.memory_space<vmem>>, vector<1x8x128xf32>
    tpu.vector_store %arg5[%c0_18, %c0_19, %c0_20], %40 {strides = array<i32>} : memref<1x8x128xf32, #tpu.memory_space<vmem>>, vector<1x8x128xf32>,
    %cst_21 = arith.constant dense<0.000000e+00> : vector<128xf32>
    %42 = vector.multi_reduction <add>, %39, %cst_21 [0] : vector<8x128xf32> to vector<128xf32>
    %cst_22 = arith.constant 1.250000e-01 : f32
    %43 = vector.broadcast %cst_22 : f32 to vector<128xf32>
    %44 = arith.mulf %42, %43 : vector<128xf32>
    %45 = vector.shape_cast %44 : vector<128xf32> to vector<1x128xf32>
    %46 = vector.broadcast %45 : vector<1x128xf32> to vector<8x128xf32>
    %47 = arith.subf %39, %46 : vector<8x128xf32>
    %48 = vector.shape_cast %42 : vector<128xf32> to vector<1x1x128xf32>
    %c0_23 = arith.constant 0 : index
    %c0_24 = arith.constant 0 : index
    %c0_25 = arith.constant 0 : index
    %49 = vector.load %arg6[%c0_23, %c0_24, %c0_25] : memref<1x2x128xf32, #tpu.memory_space<vmem>>, vector<1x1x128xf32>
    tpu.vector_store %arg6[%c0_23, %c0_24, %c0_25], %48 {strides = array<i32>} : memref<1x2x128xf32, #tpu.memory_space<vmem>>, vector<1x1x128xf32>,
    %50 = arith.mulf %47, %47 : vector<8x128xf32>
    %cst_26 = arith.constant dense<0.000000e+00> : vector<128xf32>
    %51 = vector.multi_reduction <add>, %50, %cst_26 [0] : vector<8x128xf32> to vector<128xf32>
    %52 = vector.shape_cast %51 : vector<128xf32> to vector<1x1x128xf32>
    %c0_27 = arith.constant 0 : index
    %c1_28 = arith.constant 1 : index
    %c0_29 = arith.constant 0 : index
    %53 = vector.load %arg6[%c0_27, %c1_28, %c0_29] : memref<1x2x128xf32, #tpu.memory_space<vmem>>, vector<1x1x128xf32>
    tpu.vector_store %arg6[%c0_27, %c1_28, %c0_29], %52 {strides = array<i32>} : memref<1x2x128xf32, #tpu.memory_space<vmem>>, vector<1x1x128xf32>,
    return
  }
  func.func @transform_0(%arg0: i32) -> (i32, i32, i32) {
    %c0_i32 = arith.constant 0 : i32
    %c0_i32_0 = arith.constant 0 : i32
    %c0_i32_1 = arith.constant 0 : i32
    return %arg0, %c0_i32, %c0_i32_0 : i32, i32, i32
  }
  func.func @transform_1(%arg0: i32) -> (i32, i32, i32) {
    %c0_i32 = arith.constant 0 : i32
    %c0_i32_0 = arith.constant 0 : i32
    %c0_i32_1 = arith.constant 0 : i32
    %c0_i32_2 = arith.constant 0 : i32
    return %c0_i32, %c0_i32_0, %c0_i32_1 : i32, i32, i32
  }
  func.func @transform_2(%arg0: i32) -> (i32, i32) {
    %c0_i32 = arith.constant 0 : i32
    %c0_i32_0 = arith.constant 0 : i32
    %c0_i32_1 = arith.constant 0 : i32
    return %c0_i32, %c0_i32_0 : i32, i32
  }
  func.func @transform_3(%arg0: i32) -> (i32, i32) {
    %c0_i32 = arith.constant 0 : i32
    %c0_i32_0 = arith.constant 0 : i32
    %c0_i32_1 = arith.constant 0 : i32
    return %c0_i32, %c0_i32_0 : i32, i32
  }
  func.func @transform_4(%arg0: i32) -> (i32, i32, i32) {
    %c0_i32 = arith.constant 0 : i32
    %c0_i32_0 = arith.constant 0 : i32
    %c0_i32_1 = arith.constant 0 : i32
    return %arg0, %c0_i32, %c0_i32_0 : i32, i32, i32
  }
  func.func @transform_5(%arg0: i32) -> (i32, i32, i32) {
    %c0_i32 = arith.constant 0 : i32
    %c0_i32_0 = arith.constant 0 : i32
    %c0_i32_1 = arith.constant 0 : i32
    return %arg0, %c0_i32, %c0_i32_0 : i32, i32, i32
  }
}

module attributes {stable_mosaic.version = 11 : i64} {
  func.func @_finalize_kernel(%arg0: i32, %arg1: memref<1x8x128xf32, #tpu.memory_space<vmem>>, %arg2: memref<1x8x128xf32, #tpu.memory_space<vmem>>, %arg3: memref<1x128xf32, #tpu.memory_space<vmem>>, %arg4: memref<1x128xf32, #tpu.memory_space<vmem>>, %arg5: memref<1x128xf32, #tpu.memory_space<vmem>>, %arg6: memref<1x8x128xf32, #tpu.memory_space<vmem>>) attributes {dimension_semantics = [#tpu.dimension_semantics<parallel>], iteration_bounds = array<i64: 2>, scalar_prefetch = 0 : i64, scratch_operands = 0 : i64, tpu.core_type = #tpu.core_type<tc>, window_params = [{transform_indices = @transform_0, window_bounds = array<i64: 1, 8, 128>}, {transform_indices = @transform_1, window_bounds = array<i64: 1, 8, 128>}, {pipeline_mode = #tpu.pipeline_mode<synchronous>, transform_indices = @transform_2, window_bounds = array<i64: 1, 128>}, {pipeline_mode = #tpu.pipeline_mode<synchronous>, transform_indices = @transform_3, window_bounds = array<i64: 1, 128>}, {pipeline_mode = #tpu.pipeline_mode<synchronous>, transform_indices = @transform_4, window_bounds = array<i64: 1, 128>}, {transform_indices = @transform_5, window_bounds = array<i64: 1, 8, 128>}]} {
    %c0 = arith.constant 0 : index
    %c0_0 = arith.constant 0 : index
    %c0_1 = arith.constant 0 : index
    %0 = vector.load %arg1[%c0, %c0_0, %c0_1] : memref<1x8x128xf32, #tpu.memory_space<vmem>>, vector<1x8x128xf32>
    %c0_2 = arith.constant 0 : index
    %c0_3 = arith.constant 0 : index
    %1 = vector.load %arg3[%c0_2, %c0_3] : memref<1x128xf32, #tpu.memory_space<vmem>>, vector<1x128xf32>
    %2 = vector.shape_cast %1 : vector<1x128xf32> to vector<1x1x128xf32>
    %3 = vector.broadcast %2 : vector<1x1x128xf32> to vector<1x8x128xf32>
    %4 = arith.mulf %0, %3 : vector<1x8x128xf32>
    %c0_4 = arith.constant 0 : index
    %c0_5 = arith.constant 0 : index
    %c0_6 = arith.constant 0 : index
    %5 = vector.load %arg2[%c0_4, %c0_5, %c0_6] : memref<1x8x128xf32, #tpu.memory_space<vmem>>, vector<1x8x128xf32>
    %c0_7 = arith.constant 0 : index
    %c0_8 = arith.constant 0 : index
    %6 = vector.load %arg4[%c0_7, %c0_8] : memref<1x128xf32, #tpu.memory_space<vmem>>, vector<1x128xf32>
    %7 = vector.shape_cast %6 : vector<1x128xf32> to vector<1x1x128xf32>
    %8 = vector.broadcast %7 : vector<1x1x128xf32> to vector<1x8x128xf32>
    %9 = arith.mulf %5, %8 : vector<1x8x128xf32>
    %10 = arith.addf %4, %9 : vector<1x8x128xf32>
    %c0_9 = arith.constant 0 : index
    %c0_10 = arith.constant 0 : index
    %11 = vector.load %arg5[%c0_9, %c0_10] : memref<1x128xf32, #tpu.memory_space<vmem>>, vector<1x128xf32>
    %12 = vector.shape_cast %11 : vector<1x128xf32> to vector<1x1x128xf32>
    %13 = vector.broadcast %12 : vector<1x1x128xf32> to vector<1x8x128xf32>
    %14 = arith.addf %10, %13 : vector<1x8x128xf32>
    %cst = arith.constant 0.000000e+00 : f32
    %15 = vector.broadcast %cst : f32 to vector<1x8x128xf32>
    %16 = arith.maximumf %14, %15 : vector<1x8x128xf32>
    %c0_11 = arith.constant 0 : index
    %c0_12 = arith.constant 0 : index
    %c0_13 = arith.constant 0 : index
    %17 = vector.load %arg6[%c0_11, %c0_12, %c0_13] : memref<1x8x128xf32, #tpu.memory_space<vmem>>, vector<1x8x128xf32>
    tpu.vector_store %arg6[%c0_11, %c0_12, %c0_13], %16 {strides = array<i32>} : memref<1x8x128xf32, #tpu.memory_space<vmem>>, vector<1x8x128xf32>,
    return
  }
  func.func @transform_0(%arg0: i32) -> (i32, i32, i32) {
    %c0_i32 = arith.constant 0 : i32
    %c0_i32_0 = arith.constant 0 : i32
    %c0_i32_1 = arith.constant 0 : i32
    return %arg0, %c0_i32, %c0_i32_0 : i32, i32, i32
  }
  func.func @transform_1(%arg0: i32) -> (i32, i32, i32) {
    %c0_i32 = arith.constant 0 : i32
    %c0_i32_0 = arith.constant 0 : i32
    %c0_i32_1 = arith.constant 0 : i32
    return %arg0, %c0_i32, %c0_i32_0 : i32, i32, i32
  }
  func.func @transform_2(%arg0: i32) -> (i32, i32) {
    %c0_i32 = arith.constant 0 : i32
    %c0_i32_0 = arith.constant 0 : i32
    %c0_i32_1 = arith.constant 0 : i32
    return %c0_i32, %c0_i32_0 : i32, i32
  }
  func.func @transform_3(%arg0: i32) -> (i32, i32) {
    %c0_i32 = arith.constant 0 : i32
    %c0_i32_0 = arith.constant 0 : i32
    %c0_i32_1 = arith.constant 0 : i32
    return %c0_i32, %c0_i32_0 : i32, i32
  }
  func.func @transform_4(%arg0: i32) -> (i32, i32) {
    %c0_i32 = arith.constant 0 : i32
    %c0_i32_0 = arith.constant 0 : i32
    %c0_i32_1 = arith.constant 0 : i32
    return %c0_i32, %c0_i32_0 : i32, i32
  }
  func.func @transform_5(%arg0: i32) -> (i32, i32, i32) {
    %c0_i32 = arith.constant 0 : i32
    %c0_i32_0 = arith.constant 0 : i32
    %c0_i32_1 = arith.constant 0 : i32
    return %arg0, %c0_i32, %c0_i32_0 : i32, i32, i32
  }
}

</mosaic_0001>

<bundles_post_ra>
// kernel: resblk_pallas.3
= control target key start
LH: loop header
LB: loop body
LE: loop exit
PB: predicated region body
PF: predicated region fallthrough
CT: control target
= control target key end

     0   :  { %s724_s21 = smov 0   ;;  %s767_s0 = inlined_call_operand.vmem [shape: f32[2,8,12], index: 0, kind: input, shape index: {}]   ;;  %s768_s1 = inlined_call_operand.vmem [shape: f32[12,128], index: 1, kind: input, shape index: {}]   ;;  %s769_s2 = inlined_call_operand.vmem [shape: f32[12,128], index: 2, kind: input, shape index: {}]   ;;  %s770_s3 = inlined_call_operand.vmem [shape: f32[2,17,128], index: 3, kind: output, shape index: {0}]   ;;  %s771_s4 = inlined_call_operand.vmem [shape: f32[2,8,128], index: 4, kind: output, shape index: {1}]   ;;  %s772_s5 = inlined_call_operand.vmem [shape: f32[2,2,128], index: 5, kind: output, shape index: {2}]   ;;  %s773_s6 = inlined_call_operand.vmem [shape: f32[2,2,128], index: 6, kind: output, shape index: {3}]  }
   0x1 LB: > { %s620_s22 = sadd.s32 4294967295, %s683_s21   ;;  %p624_p0 = scmp.ge.s32.totalorder %s683_s21, 1  ;;  %s683_s21 = sphi %s724_s21, %s17_s21  }
   0x2   : > { %p218_p1 = scmp.lt.s32.totalorder %s683_s21, 3 }
   0x4   : > { %p219_p2 = pnand %p624_p0, %p218_p1 }
   0x5   : > { %v281_v0 = vld [vmem:[%s768_s1] sm:$0xff] (!%p219_p2)  ;;  %v282_v1 = vld [vmem:[%s768_s1 + $0x8] sm:$0xf] (!%p219_p2)  ;;  %vm287_vm0 = vcmask (!%p219_p2), 1043456   ;;  %v685_v2 = vmov (!%p219_p2), 0.0|0.0   ;;  %vm686_vm1 = vmmov (!%p219_p2), 1  }
   0x6   : > { %222 = sbr.rel (%p219_p2) target bundleno = 260 (0x104), region = 32  ;;  %656 = vmatprep.subr.bf16.mxu0 (!%p219_p2), %v685_v2  ;;  %660 = vmatprep.subr.bf16.mxu1 (!%p219_p2), %v685_v2  ;;  %v657_v3 = vpack.c.bf16 (!%p219_p2), %v282_v1, %v281_v0  ;;  %vm658_vm2 = vmpackc.low (!%p219_p2), %vm287_vm0, %vm686_vm1  ;;  %v361_v4 = vld [vmem:[%s769_s2] sm:$0xff] (!%p219_p2)  ;;  %v362_v5 = vld [vmem:[%s769_s2 + $0x8] sm:$0xf] (!%p219_p2)  ;;  %p259_p3 = scmp.lt.s32.totalorder (!%p219_p2), %s620_s22, 1  ;;  %vm687_vm3 = vmmov (!%p219_p2), 0  }
   0x7   : > { %v661_v6 = vpack.c.bf16 (!%p219_p2), %v362_v5, %v361_v4  ;;  %v688_v7 = vmov (!%p219_p2), 0.0   ;;  %vm283_vm4 = vcmask (!%p219_p2), 97280  }
   0x8   : > { %646 = vmatprep.mubr.msk.f32.mxu0 (!%p219_p2), %vm687_vm3, %v688_v7  ;;  %653 = vmatprep.mubr.msk.f32.mxu1 (!%p219_p2), %vm687_vm3, %v688_v7 }
   0x9   : > { %659 = vmatpush3.bf16.msk.msra.mxu0 (!%p219_p2), %vm658_vm2, %v657_v3  ;;  %663 = vmatpush3.bf16.msk.msra.mxu1 (!%p219_p2), %vm658_vm2, %v661_v6 }
   0xd   : > { %s775_s22 = smov (!%p259_p3, %s620_s22), 1 }
   0xe   : > { %s625_s7 = sshll.u32 %s775_s22, 3  ;;  %s664_s11 = smul.u32 24, %s775_s22 }
   0xf   : > { %s262_s10 = scalar_lea.vmem %s767_s0, %s625_s7  ;;  %s271_s14 = scalar_lea.vmem %s771_s4, %s625_s7 }
  0x10   : > { %v280_v8 = vld [vmem:[%s262_s10] sm:$0xff]  ;;  %s267_s17 = scalar_lea.vmem %s770_s3, %s664_s11  ;;  %s628_s18 = sshll.u32 %s775_s22, 1 }
  0x11   : > { %647 = vmatmul.mubr.msk.f32.vlgmr.msra.gmra.mrb[0].mxu0 %vm283_vm4, %v280_v8  ;;  %654 = vmatmul.mubr.msk.f32.vlgmr.msra.gmra.mrb[0].mxu1 %vm283_vm4, %v280_v8  ;;  %s275_s23 = scalar_lea.vmem %s772_s5, %s628_s18  ;;  %s279_s26 = scalar_lea.vmem %s773_s6, %s628_s18 }
  0xe4   : > { %v357_v9 = vpop.f32.mrb[0].mxu0  ;;  %v432_v10 = vpop.f32.mrb[0].mxu1 }
  0xe5   : > { %436 = vst [vmem:[%s267_s17 + $0x8] sm:$0xff] %v357_v9  ;;  %v438_v11 = vrot.slane %v357_v9, 4  ;;  %437 = vst [vmem:[%s271_s14] sm:$0xff] %v432_v10  ;;  %v455_v12 = vrot.slane %v432_v10, 4  ;;  %v648_v13 = vpop.f32.mrb[1].mxu0  ;;  %v655_v14 = vpop.f32.mrb[1].mxu1 }
  0xe7   : > { %v439_v15 = vadd.f32 %v438_v11, %v357_v9  ;;  %v456_v16 = vadd.f32 %v455_v12, %v432_v10 }
  0xe9   : > { %v440_v17 = vrot.slane %v439_v15, 2  ;;  %v457_v18 = vrot.slane %v456_v16, 2 }
  0xeb   : > { %v441_v19 = vadd.f32 %v440_v17, %v439_v15  ;;  %v458_v20 = vadd.f32 %v457_v18, %v456_v16 }
  0xed   : > { %v442_v21 = vrot.slane %v441_v19, 1  ;;  %v459_v22 = vrot.slane %v458_v20, 1 }
  0xef   : > { %v443_v23 = vadd.f32 %v442_v21, %v441_v19  ;;  %v460_v24 = vadd.f32 %v459_v22, %v458_v20 }
  0xf1   : > { %v444_v25 = vmul.f32 0.125, %v443_v23  ;;  %446 = vst [vmem:[%s275_s23] sm:$0x1] %v443_v23  ;;  %v461_v26 = vmul.f32 0.125, %v460_v24  ;;  %463 = vst [vmem:[%s279_s26] sm:$0x1] %v460_v24 }
  0xf3   : > { %v445_v27 = vsub.f32 %v357_v9, %v444_v25  ;;  %v462_v28 = vsub.f32 %v432_v10, %v461_v26 }
  0xf5   : > { %v447_v29 = vmul.f32 %v445_v27, %v445_v27  ;;  %v464_v30 = vmul.f32 %v462_v28, %v462_v28 }
  0xf7   : > { %v448_v31 = vrot.slane %v447_v29, 4  ;;  %v465_v32 = vrot.slane %v464_v30, 4 }
  0xf9   : > { %v449_v33 = vadd.f32 %v448_v31, %v447_v29  ;;  %v466_v34 = vadd.f32 %v465_v32, %v464_v30 }
  0xfb   : > { %v450_v35 = vrot.slane %v449_v33, 2  ;;  %v467_v36 = vrot.slane %v466_v34, 2 }
  0xfd   : > { %v451_v37 = vadd.f32 %v450_v35, %v449_v33  ;;  %v468_v38 = vadd.f32 %v467_v36, %v466_v34 }
  0xff   : > { %v452_v39 = vrot.slane %v451_v37, 1  ;;  %v469_v40 = vrot.slane %v468_v38, 1 }
 0x101   : > { %v453_v41 = vadd.f32 %v452_v39, %v451_v37  ;;  %v470_v42 = vadd.f32 %v469_v40, %v468_v38 }
 0x103   : > { %454 = vst [vmem:[%s275_s23 + $0x1] sm:$0x1] %v453_v41  ;;  %471 = vst [vmem:[%s279_s26 + $0x1] sm:$0x1] %v470_v42 }
 0x104 PF: > { %s17_s21 = sadd.s32 1, %s683_s21  }
 0x105   : > { %p14_p4 = scmp.ge.s32.totalorder %s17_s21, 4  }
 0x107   :  { %16 = sbr.rel (!%p14_p4) target bundleno = 1 (0x1), region = 98 }

// kernel: resblk_pallas.5
= control target key start
LH: loop header
LB: loop body
LE: loop exit
PB: predicated region body
PF: predicated region fallthrough
CT: control target
= control target key end

     0   :  { %s390_s18 = smov 0   ;;  %s413_s0 = inlined_call_operand.vmem [shape: f32[2,8,128], index: 0, kind: input, shape index: {}, may-alias: {0,5}]   ;;  %s414_s1 = inlined_call_operand.vmem [shape: f32[2,8,128], index: 1, kind: input, shape index: {}]   ;;  %s415_s2 = inlined_call_operand.vmem [shape: f32[1,128], index: 2, kind: input, shape index: {}]   ;;  %s416_s3 = inlined_call_operand.vmem [shape: f32[1,128], index: 3, kind: input, shape index: {}]   ;;  %s417_s4 = inlined_call_operand.vmem [shape: f32[1,128], index: 4, kind: input, shape index: {}]   ;;  %s418_s5 = inlined_call_operand.vmem [shape: f32[2,8,128], index: 5, kind: output, shape index: {}, may-alias: {0,5}]  }
   0x1 LB: > { %s331_s19 = sadd.s32 4294967295, %s358_s18   ;;  %p335_p0 = scmp.ge.s32.totalorder %s358_s18, 1  ;;  %s358_s18 = sphi %s390_s18, %s15_s18  }
   0x2   : > { %p195_p1 = scmp.lt.s32.totalorder %s358_s18, 3 }
   0x4   : > { %p196_p2 = pnand %p335_p0, %p195_p1 }
   0x5   : > { %p225_p3 = scmp.lt.s32.totalorder (!%p196_p2), %s331_s19, 1  ;;  %v339_v0 = vld [vmem:[%s415_s2] ss:$0 sm:$0xff] (!%p196_p2) }
   0x6   : > { %199 = sbr.rel (%p196_p2) target bundleno = 27 (0x1b), region = 40  ;;  %v340_v1 = vld [vmem:[%s416_s3] ss:$0 sm:$0xff] (!%p196_p2) }
   0x7   : > { %v341_v6 = vld [vmem:[%s417_s4] ss:$0 sm:$0xff] (!%p196_p2) }
   0xd   : > { %s420_s19 = smov (!%p225_p3, %s331_s19), 1 }
   0xe   : > { %s336_s20 = sshll.u32 %s420_s19, 3 }
   0xf   : > { %s228_s27 = scalar_lea.vmem %s413_s0, %s336_s20  ;;  %s232_s30 = scalar_lea.vmem %s414_s1, %s336_s20 }
  0x10   : > { %v237_v2 = vld [vmem:[%s228_s27] sm:$0xff]  ;;  %s236_s10 = scalar_lea.vmem %s418_s5, %s336_s20 }
  0x11   : > { %v246_v3 = vld [vmem:[%s232_s30] sm:$0xff]  ;;  %v245_v4 = vmul.f32 %v339_v0, %v237_v2 }
  0x12   : > { %v254_v5 = vmul.f32 %v340_v1, %v246_v3 }
  0x14   : > { %v255_v7 = vadd.f32 %v254_v5, %v245_v4 }
  0x16   : > { %v263_v8 = vadd.f32 %v341_v6, %v255_v7 }
  0x18   : > { %v264_v9 = vmax.f32 %v263_v8, 0.0 }
  0x1a   : > { %265 = vst [vmem:[%s236_s10] sm:$0xff] %v264_v9 }
  0x1b PF: > { %s15_s18 = sadd.s32 1, %s358_s18  }
  0x1c   : > { %p12_p4 = scmp.ge.s32.totalorder %s15_s18, 4  }
  0x1e   :  { %14 = sbr.rel (!%p12_p4) target bundleno = 1 (0x1), region = 73 }

// kernel: resblk_pallas.4
= control target key start
LH: loop header
LB: loop body
LE: loop exit
PB: predicated region body
PF: predicated region fallthrough
CT: control target
= control target key end

     0   :  { %s986_s18 = smov 0   ;;  %s1198_s0 = inlined_call_operand.vmem [shape: f32[2,17,128], index: 0, kind: input, shape index: {}]   ;;  %s1199_s1 = inlined_call_operand.vmem [shape: f32[3,128,128], index: 1, kind: input, shape index: {}]   ;;  %s1200_s2 = inlined_call_operand.vmem [shape: f32[1,128], index: 2, kind: input, shape index: {}]   ;;  %s1201_s3 = inlined_call_operand.vmem [shape: f32[1,128], index: 3, kind: input, shape index: {}]   ;;  %s1202_s4 = inlined_call_operand.vmem [shape: f32[2,8,128], index: 4, kind: output, shape index: {0}]   ;;  %s1203_s5 = inlined_call_operand.vmem [shape: f32[2,2,128], index: 5, kind: output, shape index: {1}]  }
   0x1 LB: > { %s658_s19 = sadd.s32 4294967295, %s951_s18   ;;  %p662_p0 = scmp.ge.s32.totalorder %s951_s18, 1  ;;  %s951_s18 = sphi %s986_s18, %s16_s18  }
   0x2   : > { %p190_p1 = scmp.lt.s32.totalorder %s951_s18, 3 }
   0x4   : > { %p191_p2 = pnand %p662_p0, %p190_p1 }
   0x5   : > { %v282_v0 = vld [vmem:[%s1199_s1] sm:$0xff] (!%p191_p2)  ;;  %v283_v1 = vld [vmem:[%s1199_s1 + $0x8] sm:$0xff] (!%p191_p2)  ;;  %v284_v2 = vld [vmem:[%s1199_s1 + $0x10] sm:$0xff] (!%p191_p2)  ;;  %v953_v3 = vmov (!%p191_p2), 0.0|0.0   ;;  %p221_p3 = scmp.lt.s32.totalorder (!%p191_p2), %s658_s19, 1  ;;  %vm954_vm0 = vmmov (!%p191_p2), 0  }
   0x6   : > { %194 = sbr.rel (%p191_p2) target bundleno = 316 (0x13c), region = 36  ;;  %882 = vmatprep.subr.bf16.mxu0 (!%p191_p2), %v953_v3  ;;  %v883_v4 = vpack.c.bf16 (!%p191_p2), %v283_v1, %v282_v0  ;;  %v285_v5 = vld [vmem:[%s1199_s1 + $0x18] sm:$0xff] (!%p191_p2)  ;;  %858 = vmatprep.subr.bf16.mxu1 (!%p191_p2), %v953_v3  ;;  %v955_v6 = vmov (!%p191_p2), 0.0   ;;  %v286_v8 = vld [vmem:[%s1199_s1 + $0x20] sm:$0xff] (!%p191_p2)  ;;  %v287_v9 = vld [vmem:[%s1199_s1 + $0x28] sm:$0xff] (!%p191_p2)  ;;  %vm387_vm1 = vcmask (!%p191_p2), 1040384  }
   0x7   : > { %820 = vmatprep.mubr.msk.f32.mxu0 (!%p191_p2), %vm954_vm0, %v955_v6  ;;  %785 = vmatprep.mubr.msk.f32.mxu1 (!%p191_p2), %vm954_vm0, %v955_v6  ;;  %v886_v7 = vpack.c.bf16 (!%p191_p2), %v285_v5, %v284_v2  ;;  %v668_v10 = vld [vmem:[%s1199_s1 + $0x80] sm:$0xff] (!%p191_p2)  ;;  %v669_v11 = vld [vmem:[%s1199_s1 + $0x88] sm:$0xff] (!%p191_p2)  ;;  %v889_v13 = vpack.c.bf16 (!%p191_p2), %v287_v9, %v286_v8  ;;  %v670_v14 = vld [vmem:[%s1199_s1 + $0x90] sm:$0xff] (!%p191_p2)  ;;  %v388_v52 = vrot.slane (!%p191_p2), %v955_v6, 7  ;;  %vm480_vm2 = vcmask (!%p191_p2), 1046528  }
   0x8   : > { %884 = vmatpush3.bf16.msra.mxu0 (!%p191_p2), %v883_v4  ;;  %v859_v12 = vpack.c.bf16 (!%p191_p2), %v669_v11, %v668_v10  ;;  %v671_v15 = vld [vmem:[%s1199_s1 + $0x98] sm:$0xff] (!%p191_p2)  ;;  %v288_v16 = vld [vmem:[%s1199_s1 + $0x30] sm:$0xff] (!%p191_p2)  ;;  %v672_v19 = vld [vmem:[%s1199_s1 + $0xa0] sm:$0xff] (!%p191_p2) }
   0x9   : > { %885 = vmatprep.subr.bf16.mxu0 (!%p191_p2), %v953_v3  ;;  %v289_v17 = vld [vmem:[%s1199_s1 + $0x38] sm:$0xff] (!%p191_p2)  ;;  %v862_v18 = vpack.c.bf16 (!%p191_p2), %v671_v15, %v670_v14  ;;  %v673_v20 = vld [vmem:[%s1199_s1 + $0xa8] sm:$0xff] (!%p191_p2)  ;;  %v290_v22 = vld [vmem:[%s1199_s1 + $0x40] sm:$0xff] (!%p191_p2) }
   0xa   : > { %860 = vmatpush3.bf16.msra.mxu1 (!%p191_p2), %v859_v12  ;;  %v892_v21 = vpack.c.bf16 (!%p191_p2), %v289_v17, %v288_v16  ;;  %v291_v23 = vld [vmem:[%s1199_s1 + $0x48] sm:$0xff] (!%p191_p2)  ;;  %v666_v25 = vld [vmem:[%s1200_s2] ss:$0 sm:$0xff] (!%p191_p2)  ;;  %v865_v26 = vpack.c.bf16 (!%p191_p2), %v673_v20, %v672_v19  ;;  %v674_v27 = vld [vmem:[%s1199_s1 + $0xb0] sm:$0xff] (!%p191_p2) }
   0xb   : > { %861 = vmatprep.subr.bf16.mxu1 (!%p191_p2), %v953_v3  ;;  %v675_v28 = vld [vmem:[%s1199_s1 + $0xb8] sm:$0xff] (!%p191_p2)  ;;  %v895_v29 = vpack.c.bf16 (!%p191_p2), %v291_v23, %v290_v22  ;;  %v292_v31 = vld [vmem:[%s1199_s1 + $0x50] sm:$0xff] (!%p191_p2)  ;;  %v667_v33 = vld [vmem:[%s1201_s3] ss:$0 sm:$0xff] (!%p191_p2)  ;;  %v482_v22 = vrot.slane (!%p191_p2), %v955_v6, 1 }
   0xc   : > { %887 = vmatpush3.bf16.msra.mxu0 (!%p191_p2), %v886_v7  ;;  %v293_v32 = vld [vmem:[%s1199_s1 + $0x58] sm:$0xff] (!%p191_p2)  ;;  %v868_v34 = vpack.c.bf16 (!%p191_p2), %v675_v28, %v674_v27  ;;  %v676_v35 = vld [vmem:[%s1199_s1 + $0xc0] sm:$0xff] (!%p191_p2)  ;;  %v677_v36 = vld [vmem:[%s1199_s1 + $0xc8] sm:$0xff] (!%p191_p2) }
   0xd   : > { %s1205_s19 = smov (!%p221_p3, %s658_s19), 1  ;;  %888 = vmatprep.subr.bf16.mxu0 %v953_v3  ;;  %v898_v37 = vpack.c.bf16 %v293_v32, %v292_v31  ;;  %v294_v39 = vld [vmem:[%s1199_s1 + $0x60] sm:$0xff]  ;;  %v295_v40 = vld [vmem:[%s1199_s1 + $0x68] sm:$0xff]  ;;  %v871_v41 = vpack.c.bf16 %v677_v36, %v676_v35  ;;  %v678_v42 = vld [vmem:[%s1199_s1 + $0xd0] sm:$0xff] }
   0xe   : > { %s933_s11 = smul.u32 24, %s1205_s19  ;;  %863 = vmatpush3.bf16.msra.mxu1 %v862_v18  ;;  %v679_v43 = vld [vmem:[%s1199_s1 + $0xd8] sm:$0xff]  ;;  %v901_v44 = vpack.c.bf16 %v295_v40, %v294_v39  ;;  %v296_v46 = vld [vmem:[%s1199_s1 + $0x70] sm:$0xff]  ;;  %v680_v49 = vld [vmem:[%s1199_s1 + $0xe0] sm:$0xff]  ;;  %s664_s7 = sshll.u32 %s1205_s19, 3 }
   0xf   : > { %864 = vmatprep.subr.bf16.mxu1 %v953_v3  ;;  %v297_v47 = vld [vmem:[%s1199_s1 + $0x78] sm:$0xff]  ;;  %v874_v48 = vpack.c.bf16 %v679_v43, %v678_v42  ;;  %v681_v50 = vld [vmem:[%s1199_s1 + $0xe8] sm:$0xff]  ;;  %v684_v54 = vld [vmem:[%s1199_s1 + $0x100] sm:$0xff]  ;;  %s229_s10 = scalar_lea.vmem %s1202_s4, %s664_s7 }
  0x10   : > { %s225_s24 = scalar_lea.vmem %s1198_s0, %s933_s11  ;;  %890 = vmatpush3.bf16.msra.mxu0 %v889_v13  ;;  %v904_v51 = vpack.c.bf16 %v297_v47, %v296_v46  ;;  %v685_v55 = vld [vmem:[%s1199_s1 + $0x108] sm:$0xff]  ;;  %v877_v56 = vpack.c.bf16 %v681_v50, %v680_v49  ;;  %v682_v57 = vld [vmem:[%s1199_s1 + $0xf0] sm:$0xff]  ;;  %v683_v58 = vld [vmem:[%s1199_s1 + $0xf8] sm:$0xff]  ;;  %s665_s11 = sshll.u32 %s1205_s19, 1 }
  0x11   : > { %891 = vmatprep.subr.bf16.mxu0 %v953_v3  ;;  %v235_v24 = vld [vmem:[%s225_s24 + $0x8] sm:$0xff]  ;;  %v907_v60 = vpack.c.bf16 %v685_v55, %v684_v54  ;;  %v686_v61 = vld [vmem:[%s1199_s1 + $0x110] sm:$0xff]  ;;  %v687_v62 = vld [vmem:[%s1199_s1 + $0x118] sm:$0xff]  ;;  %v880_v63 = vpack.c.bf16 %v683_v58, %v682_v57  ;;  %s233_s14 = scalar_lea.vmem %s1203_s5, %s665_s11 }
  0x12   : > { %v258_v30 = vmul.f32 %v666_v25, %v235_v24  ;;  %866 = vmatpush3.bf16.msra.mxu1 %v865_v26  ;;  %v910_v0 = vpack.c.bf16 %v687_v62, %v686_v61  ;;  %v688_v1 = vld [vmem:[%s1199_s1 + $0x120] sm:$0xff]  ;;  %v689_v2 = vld [vmem:[%s1199_s1 + $0x128] sm:$0xff]  ;;  %v690_v5 = vld [vmem:[%s1199_s1 + $0x130] sm:$0xff] }
  0x13   : > { %867 = vmatprep.subr.bf16.mxu1 %v953_v3  ;;  %v913_v4 = vpack.c.bf16 %v689_v2, %v688_v1  ;;  %v691_v7 = vld [vmem:[%s1199_s1 + $0x138] sm:$0xff]  ;;  %v692_v9 = vld [vmem:[%s1199_s1 + $0x140] sm:$0xff]  ;;  %v693_v10 = vld [vmem:[%s1199_s1 + $0x148] sm:$0xff] }
  0x14   : > { %893 = vmatpush3.bf16.msra.mxu0 %v892_v21  ;;  %v268_v38 = vadd.f32 %v667_v33, %v258_v30  ;;  %v916_v8 = vpack.c.bf16 %v691_v7, %v690_v5  ;;  %v919_v11 = vpack.c.bf16 %v693_v10, %v692_v9  ;;  %v694_v12 = vld [vmem:[%s1199_s1 + $0x150] sm:$0xff]  ;;  %v695_v13 = vld [vmem:[%s1199_s1 + $0x158] sm:$0xff]  ;;  %v696_v15 = vld [vmem:[%s1199_s1 + $0x160] sm:$0xff] }
  0x15   : > { %894 = vmatprep.subr.bf16.mxu0 %v953_v3  ;;  %v922_v14 = vpack.c.bf16 %v695_v13, %v694_v12  ;;  %v697_v16 = vld [vmem:[%s1199_s1 + $0x168] sm:$0xff]  ;;  %v698_v18 = vld [vmem:[%s1199_s1 + $0x170] sm:$0xff]  ;;  %v699_v19 = vld [vmem:[%s1199_s1 + $0x178] sm:$0xff] }
  0x16   : > { %869 = vmatpush3.bf16.msra.mxu1 %v868_v34  ;;  %v1099_v45 = vmax.f32 %v268_v38, 0.0  ;;  %v925_v17 = vpack.c.bf16 %v697_v16, %v696_v15  ;;  %v928_v20 = vpack.c.bf16 %v699_v19, %v698_v18 }
  0x17   : > { %870 = vmatprep.subr.bf16.mxu1 %v953_v3 }
  0x18   : > { %896 = vmatpush3.bf16.msra.mxu0 %v895_v29  ;;  %v389_v53 = vrot.slane %v1099_v45, 7  ;;  %v481_v21 = vrot.slane %v1099_v45, 1 }
  0x19   : > { %897 = vmatprep.subr.bf16.mxu0 %v953_v3 }
  0x1a   : > { %872 = vmatpush3.bf16.msra.mxu1 %v871_v41  ;;  %v390_v59 = vsel %vm387_vm1, %v388_v52, %v389_v53  ;;  %v483_v23 = vsel %vm480_vm2, %v481_v21, %v482_v22 }
  0x1b   : > { %873 = vmatprep.subr.bf16.mxu1 %v953_v3 }
  0x1c   : > { %899 = vmatpush3.bf16.msra.mxu0 %v898_v37 }
  0x1d   : > { %900 = vmatprep.subr.bf16.mxu0 %v953_v3 }
  0x1e   : > { %875 = vmatpush3.bf16.msra.mxu1 %v874_v48 }
  0x1f   : > { %876 = vmatprep.subr.bf16.mxu1 %v953_v3 }
  0x20   : > { %902 = vmatpush3.bf16.msra.mxu0 %v901_v44 }
  0x21   : > { %903 = vmatprep.subr.bf16.mxu0 %v953_v3 }
  0x22   : > { %878 = vmatpush3.bf16.msra.mxu1 %v877_v56 }
  0x23   : > { %879 = vmatprep.subr.bf16.mxu1 %v953_v3 }
  0x24   : > { %905 = vmatpush3.bf16.msra.mxu0 %v904_v51 }
  0x25   : > { %906 = vmatprep.subr.bf16.mxu0 %v953_v3 }
  0x26   : > { %881 = vmatpush3.bf16.msra.mxu1 %v880_v63 }
  0x27   : > { %821 = vmatmul.mubr.f32.vlgmr.msra.gmra.mrb[0].mxu0 %v390_v59 }
  0x28   : > { %908 = vmatpush3.bf16.msra.mxu0 %v907_v60  ;;  %855 = vmatprep.mubr.msk.f32.mxu0 %vm954_vm0, %v955_v6 }
  0x29   : > { %909 = vmatprep.subr.bf16.mxu0 %v953_v3  ;;  %786 = vmatmul.mubr.f32.vlgmr.msra.gmra.mrb[0].mxu1 %v1099_v45 }
  0x2c   : > { %911 = vmatpush3.bf16.msra.mxu0 %v910_v0 }
  0x2d   : > { %912 = vmatprep.subr.bf16.mxu0 %v953_v3 }
  0x30   : > { %914 = vmatpush3.bf16.msra.mxu0 %v913_v4 }
  0x31   : > { %915 = vmatprep.subr.bf16.mxu0 %v953_v3 }
  0x34   : > { %917 = vmatpush3.bf16.msra.mxu0 %v916_v8 }
  0x35   : > { %918 = vmatprep.subr.bf16.mxu0 %v953_v3 }
  0x38   : > { %920 = vmatpush3.bf16.msra.mxu0 %v919_v11 }
  0x39   : > { %921 = vmatprep.subr.bf16.mxu0 %v953_v3 }
  0x3c   : > { %923 = vmatpush3.bf16.msra.mxu0 %v922_v14 }
  0x3d   : > { %924 = vmatprep.subr.bf16.mxu0 %v953_v3 }
  0x40   : > { %926 = vmatpush3.bf16.msra.mxu0 %v925_v17 }
  0x41   : > { %927 = vmatprep.subr.bf16.mxu0 %v953_v3 }
  0x44   : > { %929 = vmatpush3.bf16.msra.mxu0 %v928_v20 }
  0x47   : > { %856 = vmatmul.mubr.f32.vlgmr.msra.gmra.mrb[0].mxu0 %v483_v23 }
  0xfc   : > { %v381_v24 = vpop.f32.mrb[0].mxu1 }
  0xfd   : > { %v787_v25 = vpop.f32.mrb[1].mxu1 }
 0x11a   : > { %v551_v26 = vpop.f32.mrb[0].mxu0 }
 0x11b   : > { %v930_v27 = vadd.f32 %v551_v26, %v381_v24  ;;  %v857_v28 = vpop.f32.mrb[1].mxu0 }
 0x11d   : > { %556 = vst [vmem:[%s229_s10] sm:$0xff] %v930_v27  ;;  %v557_v29 = vrot.slane %v930_v27, 4 }
 0x11f   : > { %v558_v6 = vadd.f32 %v930_v27, %v557_v29 }
 0x121   : > { %v559_v30 = vrot.slane %v558_v6, 2 }
 0x123   : > { %v560_v3 = vadd.f32 %v559_v30, %v558_v6 }
 0x125   : > { %v561_v31 = vrot.slane %v560_v3, 1 }
 0x127   : > { %v562_v32 = vadd.f32 %v561_v31, %v560_v3 }
 0x129   : > { %v563_v33 = vmul.f32 0.125, %v562_v32  ;;  %565 = vst [vmem:[%s233_s14] sm:$0x1] %v562_v32 }
 0x12b   : > { %v564_v34 = vsub.f32 %v930_v27, %v563_v33 }
 0x12d   : > { %v566_v35 = vmul.f32 %v564_v34, %v564_v34 }
 0x12f   : > { %v567_v36 = vrot.slane %v566_v35, 4 }
 0x131   : > { %v568_v37 = vadd.f32 %v567_v36, %v566_v35 }
 0x133   : > { %v569_v38 = vrot.slane %v568_v37, 2 }
 0x135   : > { %v570_v39 = vadd.f32 %v569_v38, %v568_v37 }
 0x137   : > { %v571_v40 = vrot.slane %v570_v39, 1 }
 0x139   : > { %v572_v41 = vadd.f32 %v571_v40, %v570_v39 }
 0x13b   : > { %573 = vst [vmem:[%s233_s14 + $0x1] sm:$0x1] %v572_v41 }
 0x13c PF: > { %s16_s18 = sadd.s32 1, %s951_s18  }
 0x13d   : > { %p13_p4 = scmp.ge.s32.totalorder %s16_s18, 4  }
 0x13f   :  { %15 = sbr.rel (!%p13_p4) target bundleno = 1 (0x1), region = 80 }

</bundles_post_ra>
